<compile_context>
chip_gen: v7x
topology: tpu7x:2x2x1
jax: 0.10.0
libtpu: 0.0.40
codegen_flags: <defaults>
</compile_context>

<pallas_src>
import math

import jax
import jax.numpy as jnp
import numpy as np
from jax.experimental import pallas as pl
from jax.experimental.pallas import tpu as pltpu

# ---- small synthetic config -------------------------------------------------
B = 2            # batch
S = 8            # sequence length
H = 32           # hidden size
NH = 4           # num attention heads
DH = H // NH     # head dim
I = 128          # intermediate size
LN_EPS = 1e-12   # BertLayerNorm default eps


def _layer_norm(x, gamma, beta):
    # LayerNorm over last axis, biased variance (matches torch.nn.LayerNorm)
    mean = jnp.mean(x, axis=-1, keepdims=True)
    var = jnp.mean(jnp.square(x - mean), axis=-1, keepdims=True)
    inv = jax.lax.rsqrt(var + LN_EPS)
    return (x - mean) * inv * gamma + beta


def _gelu(x):
    # exact (erf-based) GELU used by BERT's ACT2FN["gelu"]
    return 0.5 * x * (1.0 + jax.lax.erf(x * (1.0 / math.sqrt(2.0))))


def bert_layer_kernel(
    mask_ref,                       # (NH*B, 1, S) f32 additive, pre-tiled
    x_ref,                          # (B, S, H) f32
    wqkv_ref, bqkv_ref,             # (H, 3H) bf16 (Q pre-scaled), (1, 3H) f32
    wao_ref, bao_ref,               # (NH, DH, H) bf16, (1, H) f32
    ln1_g_ref, ln1_b_ref,           # (1, H) f32
    wi_ref, bi_ref,                 # (H, I) bf16, (1, I) f32
    wo_ref, bo_ref,                 # (I, H) bf16, (1, H) f32
    ln2_g_ref, ln2_b_ref,           # (1, H) f32
    out_ref,                        # (B, S, H) f32
):
    R = B * S
    x = x_ref[...].reshape(R, H)                       # (16, 32) f32 residual

    # --- fused Q/K/V projection (bf16 MXU operands, f32 accumulation) --------
    qkv = jnp.dot(x.astype(jnp.bfloat16), wqkv_ref[...],
                  preferred_element_type=jnp.float32) + bqkv_ref[...]
    qkv3 = qkv.reshape(B, S, 3 * H)                    # (2, 8, 96) f32

    # regroup heads into a leading batch dim: (NH*B, S, DH), index n = h*B + b
    def heads(off):
        return jnp.concatenate(
            [qkv3[:, :, off + h * DH: off + (h + 1) * DH] for h in range(NH)],
            axis=0)

    qh = heads(0).astype(jnp.bfloat16)        # Q already scaled by 1/sqrt(DH)
    kh = heads(H).astype(jnp.bfloat16)
    vh = heads(2 * H).astype(jnp.bfloat16)

    # --- batched attention scores + softmax (f32 math) ------------------------
    scores = jnp.einsum("nsd,ntd->nst", qh, kh,
                        preferred_element_type=jnp.float32)     # (NH*B, S, S)
    scores = scores + mask_ref[...]                             # (NH*B, 1, S)
    scores = scores - jnp.max(scores, axis=-1, keepdims=True)
    p = jnp.exp(scores)
    probs = p * pl.reciprocal(jnp.sum(p, axis=-1, keepdims=True), approx=True)

    ctx = jnp.einsum("nst,ntd->nsd", probs.astype(jnp.bfloat16), vh,
                     preferred_element_type=jnp.float32)        # (NH*B, S, DH)

    # --- BertSelfOutput: heads folded into the output projection -------------
    attn_dense = None
    for h in range(NH):
        ctx_h = ctx[h * B:(h + 1) * B].reshape(R, DH).astype(jnp.bfloat16)
        part = jnp.dot(ctx_h, wao_ref[h], preferred_element_type=jnp.float32)
        attn_dense = part if attn_dense is None else attn_dense + part
    attn_out = _layer_norm(attn_dense + bao_ref[...] + x,
                           ln1_g_ref[...], ln1_b_ref[...])      # (16, 32) f32

    # --- BertIntermediate: dense + exact GELU ---------------------------------
    inter = _gelu(jnp.dot(attn_out.astype(jnp.bfloat16), wi_ref[...],
                          preferred_element_type=jnp.float32) + bi_ref[...])

    # --- BertOutput: dense + residual + LayerNorm -----------------------------
    ffn = jnp.dot(inter.astype(jnp.bfloat16), wo_ref[...],
                  preferred_element_type=jnp.float32) + bo_ref[...]
    out = _layer_norm(ffn + attn_out, ln2_g_ref[...], ln2_b_ref[...])
    out_ref[...] = out.reshape(B, S, H)


def bert_layer(hidden_states, attention_mask, params):
    """hidden_states: (B, S, H) f32; attention_mask: (B, 1, 1, S) additive."""
    scale = 1.0 / math.sqrt(DH)
    # fold the 1/sqrt(DH) score scale into the Q projection weight + bias
    wqkv = jnp.concatenate(
        [params["wq"] * scale, params["wk"], params["wv"]], axis=1
    ).astype(jnp.bfloat16)                                       # (H, 3H)
    bqkv = jnp.concatenate(
        [params["bq"] * scale, params["bk"], params["bv"]], axis=1)  # (1, 3H)
    wao_h = params["wao"].reshape(NH, DH, H).astype(jnp.bfloat16)
    wi = params["wi"].astype(jnp.bfloat16)
    wo = params["wo"].astype(jnp.bfloat16)

    # pre-tile the additive mask to one row per (head, batch):  n = h*B + b
    mask2d = attention_mask.reshape(B, S).astype(jnp.float32)
    mask_nh = jnp.tile(mask2d, (NH, 1)).reshape(NH * B, 1, S)

    operands = [
        mask_nh, hidden_states,
        wqkv, bqkv,
        wao_h, params["bao"], params["ln1_g"], params["ln1_b"],
        wi, params["bi"], wo, params["bo"], params["ln2_g"], params["ln2_b"],
    ]

    def _full_spec(arr):
        n = arr.ndim
        return pl.BlockSpec(arr.shape, lambda i, n=n: (0,) * n)

    # Single grid step: at these shapes the kernel is overhead-bound, so all
    # B*S rows are processed in one invocation with everything resident in
    # VMEM.  (Scale-up path: tile the sequence with a "parallel" grid axis so
    # v7x's two TensorCores both get work, and keep weights single-buffered.)
    return pl.pallas_call(
        bert_layer_kernel,
        out_shape=jax.ShapeDtypeStruct((B, S, H), jnp.float32),
        grid=(1,),
        in_specs=[_full_spec(a) for a in operands],
        out_specs=pl.BlockSpec((B, S, H), lambda i: (0, 0, 0)),
        compiler_params=pltpu.CompilerParams(
            dimension_semantics=("arbitrary",)),
    )(*operands)


# ------------------------- pure-JAX reference (f32, exact) --------------------
def bert_layer_ref(x, mask_ext, p):
    mask = mask_ext.reshape(B, 1, 1, S)
    q = x @ p["wq"] + p["bq"]
    k = x @ p["wk"] + p["bk"]
    v = x @ p["wv"] + p["bv"]

    def split(t):  # (B,S,H) -> (B,NH,S,DH)
        return t.reshape(B, S, NH, DH).transpose(0, 2, 1, 3)

    qh, kh, vh = split(q), split(k), split(v)
    scores = jnp.einsum("bhqd,bhkd->bhqk", qh, kh) / math.sqrt(DH) + mask
    probs = jax.nn.softmax(scores, axis=-1)
    ctx = jnp.einsum("bhqk,bhkd->bhqd", probs, vh)
    ctx = ctx.transpose(0, 2, 1, 3).reshape(B, S, H)
    attn_out = _layer_norm(ctx @ p["wao"] + p["bao"] + x, p["ln1_g"], p["ln1_b"])
    inter = _gelu(attn_out @ p["wi"] + p["bi"])
    return _layer_norm(inter @ p["wo"] + p["bo"] + attn_out,
                       p["ln2_g"], p["ln2_b"])


def init_params(key):
    ks = jax.random.split(key, 8)
    std = 0.02
    return {
        "wq":  jax.random.normal(ks[0], (H, H), jnp.float32) * std,
        "bq":  jnp.zeros((1, H), jnp.float32),
        "wk":  jax.random.normal(ks[1], (H, H), jnp.float32) * std,
        "bk":  jnp.zeros((1, H), jnp.float32),
        "wv":  jax.random.normal(ks[2], (H, H), jnp.float32) * std,
        "bv":  jnp.zeros((1, H), jnp.float32),
        "wao": jax.random.normal(ks[3], (H, H), jnp.float32) * std,
        "bao": jnp.zeros((1, H), jnp.float32),
        "ln1_g": jnp.ones((1, H), jnp.float32),
        "ln1_b": jnp.zeros((1, H), jnp.float32),
        "wi":  jax.random.normal(ks[4], (H, I), jnp.float32) * std,
        "bi":  jnp.zeros((1, I), jnp.float32),
        "wo":  jax.random.normal(ks[5], (I, H), jnp.float32) * std,
        "bo":  jnp.zeros((1, H), jnp.float32),
        "ln2_g": jnp.ones((1, H), jnp.float32),
        "ln2_b": jnp.zeros((1, H), jnp.float32),
    }


if __name__ == "__main__":
    key = jax.random.PRNGKey(0)
    k_x, k_p, k_m = jax.random.split(key, 3)

    hidden_states = jax.random.normal(k_x, (B, S, H), jnp.float32)
    # extended additive attention mask (B,1,1,S): 0 for keep, -10000 for pad
    keep = (jax.random.uniform(k_m, (B, S)) > 0.2).astype(jnp.float32)
    keep = keep.at[:, 0].set(1.0)  # guarantee at least one valid token
    attention_mask = ((1.0 - keep) * -10000.0).reshape(B, 1, 1, S)

    params = init_params(k_p)

    out = jax.jit(bert_layer)(hidden_states, attention_mask, params)
    out = jax.block_until_ready(out)

    ref = bert_layer_ref(hidden_states, attention_mask, params)
    # bf16 MXU operands + approx reciprocal => relaxed tolerance vs f32 ref
    np.testing.assert_allclose(np.asarray(out), np.asarray(ref),
                               rtol=2e-2, atol=2e-2)
    print("KERNEL_OK")
</pallas_src>

<mosaic_0001>
module attributes {stable_mosaic.version = 11 : i64} {
  func.func @bert_layer_kernel(%arg0: i32, %arg1: memref<8x1x8xf32, #tpu.memory_space<vmem>>, %arg2: memref<2x8x32xf32, #tpu.memory_space<vmem>>, %arg3: memref<32x96xbf16, #tpu.memory_space<vmem>>, %arg4: memref<1x96xf32, #tpu.memory_space<vmem>>, %arg5: memref<4x8x32xbf16, #tpu.memory_space<vmem>>, %arg6: memref<1x32xf32, #tpu.memory_space<vmem>>, %arg7: memref<1x32xf32, #tpu.memory_space<vmem>>, %arg8: memref<1x32xf32, #tpu.memory_space<vmem>>, %arg9: memref<32x128xbf16, #tpu.memory_space<vmem>>, %arg10: memref<1x128xf32, #tpu.memory_space<vmem>>, %arg11: memref<128x32xbf16, #tpu.memory_space<vmem>>, %arg12: memref<1x32xf32, #tpu.memory_space<vmem>>, %arg13: memref<1x32xf32, #tpu.memory_space<vmem>>, %arg14: memref<1x32xf32, #tpu.memory_space<vmem>>, %arg15: memref<2x8x32xf32, #tpu.memory_space<vmem>>) attributes {dimension_semantics = [#tpu.dimension_semantics<arbitrary>], iteration_bounds = array<i64: 1>, scalar_prefetch = 0 : i64, scratch_operands = 0 : i64, tpu.core_type = #tpu.core_type<tc>, window_params = [{pipeline_mode = #tpu.pipeline_mode<synchronous>, transform_indices = @transform_0, window_bounds = array<i64: 8, 1, 8>}, {pipeline_mode = #tpu.pipeline_mode<synchronous>, transform_indices = @transform_1, window_bounds = array<i64: 2, 8, 32>}, {pipeline_mode = #tpu.pipeline_mode<synchronous>, transform_indices = @transform_2, window_bounds = array<i64: 32, 96>}, {pipeline_mode = #tpu.pipeline_mode<synchronous>, transform_indices = @transform_3, window_bounds = array<i64: 1, 96>}, {pipeline_mode = #tpu.pipeline_mode<synchronous>, transform_indices = @transform_4, window_bounds = array<i64: 4, 8, 32>}, {pipeline_mode = #tpu.pipeline_mode<synchronous>, transform_indices = @transform_5, window_bounds = array<i64: 1, 32>}, {pipeline_mode = #tpu.pipeline_mode<synchronous>, transform_indices = @transform_6, window_bounds = array<i64: 1, 32>}, {pipeline_mode = #tpu.pipeline_mode<synchronous>, transform_indices = @transform_7, window_bounds = array<i64: 1, 32>}, {pipeline_mode = #tpu.pipeline_mode<synchronous>, transform_indices = @transform_8, window_bounds = array<i64: 32, 128>}, {pipeline_mode = #tpu.pipeline_mode<synchronous>, transform_indices = @transform_9, window_bounds = array<i64: 1, 128>}, {pipeline_mode = #tpu.pipeline_mode<synchronous>, transform_indices = @transform_10, window_bounds = array<i64: 128, 32>}, {pipeline_mode = #tpu.pipeline_mode<synchronous>, transform_indices = @transform_11, window_bounds = array<i64: 1, 32>}, {pipeline_mode = #tpu.pipeline_mode<synchronous>, transform_indices = @transform_12, window_bounds = array<i64: 1, 32>}, {pipeline_mode = #tpu.pipeline_mode<synchronous>, transform_indices = @transform_13, window_bounds = array<i64: 1, 32>}, {pipeline_mode = #tpu.pipeline_mode<synchronous>, transform_indices = @transform_14, window_bounds = array<i64: 2, 8, 32>}]} {
    %c0 = arith.constant 0 : index
    %c0_0 = arith.constant 0 : index
    %c0_1 = arith.constant 0 : index
    %0 = vector.load %arg2[%c0, %c0_0, %c0_1] : memref<2x8x32xf32, #tpu.memory_space<vmem>>, vector<2x8x32xf32>
    %1 = vector.shape_cast %0 : vector<2x8x32xf32> to vector<16x32xf32>
    %2 = arith.truncf %1 : vector<16x32xf32> to vector<16x32xbf16>
    %c0_2 = arith.constant 0 : index
    %c0_3 = arith.constant 0 : index
    %3 = vector.load %arg3[%c0_2, %c0_3] : memref<32x96xbf16, #tpu.memory_space<vmem>>, vector<32x96xbf16>
    %cst = arith.constant dense<0.000000e+00> : vector<16x96xf32>
    %4 = tpu.matmul %2, %3, %cst {dimension_numbers = #tpu.dot_dimension_numbers<[1], [0], [0], [1], [0, 0, 1, 1], [], []>} : vector<16x32xbf16>, vector<32x96xbf16>, vector<16x96xf32> -> vector<16x96xf32>
    %c0_4 = arith.constant 0 : index
    %c0_5 = arith.constant 0 : index
    %5 = vector.load %arg4[%c0_4, %c0_5] : memref<1x96xf32, #tpu.memory_space<vmem>>, vector<1x96xf32>
    %6 = vector.broadcast %5 : vector<1x96xf32> to vector<16x96xf32>
    %7 = arith.addf %4, %6 : vector<16x96xf32>
    %8 = vector.shape_cast %7 : vector<16x96xf32> to vector<2x8x96xf32>
    %9 = vector.extract_strided_slice %8 {offsets = [0, 0, 0], sizes = [2, 8, 8], strides = [1, 1, 1]} : vector<2x8x96xf32> to vector<2x8x8xf32>
    %10 = vector.extract_strided_slice %8 {offsets = [0, 0, 8], sizes = [2, 8, 8], strides = [1, 1, 1]} : vector<2x8x96xf32> to vector<2x8x8xf32>
    %11 = vector.extract_strided_slice %8 {offsets = [0, 0, 16], sizes = [2, 8, 8], strides = [1, 1, 1]} : vector<2x8x96xf32> to vector<2x8x8xf32>
    %12 = vector.extract_strided_slice %8 {offsets = [0, 0, 24], sizes = [2, 8, 8], strides = [1, 1, 1]} : vector<2x8x96xf32> to vector<2x8x8xf32>
    %13 = tpu.concatenate %9, %10, %11, %12 in 0 : vector<2x8x8xf32>, vector<2x8x8xf32>, vector<2x8x8xf32>, vector<2x8x8xf32> -> vector<8x8x8xf32>
    %14 = arith.truncf %13 : vector<8x8x8xf32> to vector<8x8x8xbf16>
    %15 = vector.extract_strided_slice %8 {offsets = [0, 0, 32], sizes = [2, 8, 8], strides = [1, 1, 1]} : vector<2x8x96xf32> to vector<2x8x8xf32>
    %16 = vector.extract_strided_slice %8 {offsets = [0, 0, 40], sizes = [2, 8, 8], strides = [1, 1, 1]} : vector<2x8x96xf32> to vector<2x8x8xf32>
    %17 = vector.extract_strided_slice %8 {offsets = [0, 0, 48], sizes = [2, 8, 8], strides = [1, 1, 1]} : vector<2x8x96xf32> to vector<2x8x8xf32>
    %18 = vector.extract_strided_slice %8 {offsets = [0, 0, 56], sizes = [2, 8, 8], strides = [1, 1, 1]} : vector<2x8x96xf32> to vector<2x8x8xf32>
    %19 = tpu.concatenate %15, %16, %17, %18 in 0 : vector<2x8x8xf32>, vector<2x8x8xf32>, vector<2x8x8xf32>, vector<2x8x8xf32> -> vector<8x8x8xf32>
    %20 = arith.truncf %19 : vector<8x8x8xf32> to vector<8x8x8xbf16>
    %21 = vector.extract_strided_slice %8 {offsets = [0, 0, 64], sizes = [2, 8, 8], strides = [1, 1, 1]} : vector<2x8x96xf32> to vector<2x8x8xf32>
    %22 = vector.extract_strided_slice %8 {offsets = [0, 0, 72], sizes = [2, 8, 8], strides = [1, 1, 1]} : vector<2x8x96xf32> to vector<2x8x8xf32>
    %23 = vector.extract_strided_slice %8 {offsets = [0, 0, 80], sizes = [2, 8, 8], strides = [1, 1, 1]} : vector<2x8x96xf32> to vector<2x8x8xf32>
    %24 = vector.extract_strided_slice %8 {offsets = [0, 0, 88], sizes = [2, 8, 8], strides = [1, 1, 1]} : vector<2x8x96xf32> to vector<2x8x8xf32>
    %25 = tpu.concatenate %21, %22, %23, %24 in 0 : vector<2x8x8xf32>, vector<2x8x8xf32>, vector<2x8x8xf32>, vector<2x8x8xf32> -> vector<8x8x8xf32>
    %26 = arith.truncf %25 : vector<8x8x8xf32> to vector<8x8x8xbf16>
    "tpu.trace_start"() <{level = 10 : i32, message = "nsd,ntd->nst"}> : () -> ()
    %cst_6 = arith.constant dense<0.000000e+00> : vector<8x8x8xf32>
    %27 = tpu.matmul %14, %20, %cst_6 {dimension_numbers = #tpu.dot_dimension_numbers<[2], [2], [1], [1], [0, 0, 0, 1, 1, 1], [0], [0]>} : vector<8x8x8xbf16>, vector<8x8x8xbf16>, vector<8x8x8xf32> -> vector<8x8x8xf32>
    "tpu.trace_stop"() : () -> ()
    %c0_7 = arith.constant 0 : index
    %c0_8 = arith.constant 0 : index
    %c0_9 = arith.constant 0 : index
    %28 = vector.load %arg1[%c0_7, %c0_8, %c0_9] : memref<8x1x8xf32, #tpu.memory_space<vmem>>, vector<8x1x8xf32>
    %29 = vector.broadcast %28 : vector<8x1x8xf32> to vector<8x8x8xf32>
    %30 = arith.addf %27, %29 : vector<8x8x8xf32>
    %cst_10 = arith.constant dense<0xFF800000> : vector<8x8xf32>
    %31 = vector.multi_reduction <maximumf>, %30, %cst_10 [2] : vector<8x8x8xf32> to vector<8x8xf32>
    %32 = vector.shape_cast %31 : vector<8x8xf32> to vector<8x8x1xf32>
    %33 = vector.broadcast %32 : vector<8x8x1xf32> to vector<8x8x8xf32>
    %34 = arith.subf %30, %33 : vector<8x8x8xf32>
    %35 = math.exp %34 : vector<8x8x8xf32>
    %cst_11 = arith.constant dense<0.000000e+00> : vector<8x8xf32>
    %36 = vector.multi_reduction <add>, %35, %cst_11 [2] : vector<8x8x8xf32> to vector<8x8xf32>
    %37 = vector.shape_cast %36 : vector<8x8xf32> to vector<8x8x1xf32>
    %38 = tpu.reciprocal %37 {approx = true} : vector<8x8x1xf32> -> vector<8x8x1xf32>
    %39 = vector.broadcast %38 : vector<8x8x1xf32> to vector<8x8x8xf32>
    %40 = arith.mulf %35, %39 : vector<8x8x8xf32>
    %41 = arith.truncf %40 : vector<8x8x8xf32> to vector<8x8x8xbf16>
    "tpu.trace_start"() <{level = 10 : i32, message = "nst,ntd->nsd"}> : () -> ()
    %cst_12 = arith.constant dense<0.000000e+00> : vector<8x8x8xf32>
    %42 = tpu.matmul %41, %26, %cst_12 {dimension_numbers = #tpu.dot_dimension_numbers<[2], [1], [1], [2], [0, 0, 0, 1, 1, 2], [0], [0]>} : vector<8x8x8xbf16>, vector<8x8x8xbf16>, vector<8x8x8xf32> -> vector<8x8x8xf32>
    "tpu.trace_stop"() : () -> ()
    %43 = vector.extract_strided_slice %42 {offsets = [0, 0, 0], sizes = [2, 8, 8], strides = [1, 1, 1]} : vector<8x8x8xf32> to vector<2x8x8xf32>
    %44 = vector.shape_cast %43 : vector<2x8x8xf32> to vector<16x8xf32>
    %45 = arith.truncf %44 : vector<16x8xf32> to vector<16x8xbf16>
    %c0_13 = arith.constant 0 : index
    %c0_14 = arith.constant 0 : index
    %c0_15 = arith.constant 0 : index
    %46 = vector.load %arg5[%c0_13, %c0_14, %c0_15] : memref<4x8x32xbf16, #tpu.memory_space<vmem>>, vector<1x8x32xbf16>
    %47 = vector.shape_cast %46 : vector<1x8x32xbf16> to vector<8x32xbf16>
    %cst_16 = arith.constant dense<0.000000e+00> : vector<16x32xf32>
    %48 = tpu.matmul %45, %47, %cst_16 {dimension_numbers = #tpu.dot_dimension_numbers<[1], [0], [0], [1], [0, 0, 1, 1], [], []>} : vector<16x8xbf16>, vector<8x32xbf16>, vector<16x32xf32> -> vector<16x32xf32>
    %49 = vector.extract_strided_slice %42 {offsets = [2, 0, 0], sizes = [2, 8, 8], strides = [1, 1, 1]} : vector<8x8x8xf32> to vector<2x8x8xf32>
    %50 = vector.shape_cast %49 : vector<2x8x8xf32> to vector<16x8xf32>
    %51 = arith.truncf %50 : vector<16x8xf32> to vector<16x8xbf16>
    %c1 = arith.constant 1 : index
    %c0_17 = arith.constant 0 : index
    %c0_18 = arith.constant 0 : index
    %52 = vector.load %arg5[%c1, %c0_17, %c0_18] : memref<4x8x32xbf16, #tpu.memory_space<vmem>>, vector<1x8x32xbf16>
    %53 = vector.shape_cast %52 : vector<1x8x32xbf16> to vector<8x32xbf16>
    %cst_19 = arith.constant dense<0.000000e+00> : vector<16x32xf32>
    %54 = tpu.matmul %51, %53, %cst_19 {dimension_numbers = #tpu.dot_dimension_numbers<[1], [0], [0], [1], [0, 0, 1, 1], [], []>} : vector<16x8xbf16>, vector<8x32xbf16>, vector<16x32xf32> -> vector<16x32xf32>
    %55 = arith.addf %48, %54 : vector<16x32xf32>
    %56 = vector.extract_strided_slice %42 {offsets = [4, 0, 0], sizes = [2, 8, 8], strides = [1, 1, 1]} : vector<8x8x8xf32> to vector<2x8x8xf32>
    %57 = vector.shape_cast %56 : vector<2x8x8xf32> to vector<16x8xf32>
    %58 = arith.truncf %57 : vector<16x8xf32> to vector<16x8xbf16>
    %c2 = arith.constant 2 : index
    %c0_20 = arith.constant 0 : index
    %c0_21 = arith.constant 0 : index
    %59 = vector.load %arg5[%c2, %c0_20, %c0_21] : memref<4x8x32xbf16, #tpu.memory_space<vmem>>, vector<1x8x32xbf16>
    %60 = vector.shape_cast %59 : vector<1x8x32xbf16> to vector<8x32xbf16>
    %cst_22 = arith.constant dense<0.000000e+00> : vector<16x32xf32>
    %61 = tpu.matmul %58, %60, %cst_22 {dimension_numbers = #tpu.dot_dimension_numbers<[1], [0], [0], [1], [0, 0, 1, 1], [], []>} : vector<16x8xbf16>, vector<8x32xbf16>, vector<16x32xf32> -> vector<16x32xf32>
    %62 = arith.addf %55, %61 : vector<16x32xf32>
    %63 = vector.extract_strided_slice %42 {offsets = [6, 0, 0], sizes = [2, 8, 8], strides = [1, 1, 1]} : vector<8x8x8xf32> to vector<2x8x8xf32>
    %64 = vector.shape_cast %63 : vector<2x8x8xf32> to vector<16x8xf32>
    %65 = arith.truncf %64 : vector<16x8xf32> to vector<16x8xbf16>
    %c3 = arith.constant 3 : index
    %c0_23 = arith.constant 0 : index
    %c0_24 = arith.constant 0 : index
    %66 = vector.load %arg5[%c3, %c0_23, %c0_24] : memref<4x8x32xbf16, #tpu.memory_space<vmem>>, vector<1x8x32xbf16>
    %67 = vector.shape_cast %66 : vector<1x8x32xbf16> to vector<8x32xbf16>
    %cst_25 = arith.constant dense<0.000000e+00> : vector<16x32xf32>
    %68 = tpu.matmul %65, %67, %cst_25 {dimension_numbers = #tpu.dot_dimension_numbers<[1], [0], [0], [1], [0, 0, 1, 1], [], []>} : vector<16x8xbf16>, vector<8x32xbf16>, vector<16x32xf32> -> vector<16x32xf32>
    %69 = arith.addf %62, %68 : vector<16x32xf32>
    %c0_26 = arith.constant 0 : index
    %c0_27 = arith.constant 0 : index
    %70 = vector.load %arg6[%c0_26, %c0_27] : memref<1x32xf32, #tpu.memory_space<vmem>>, vector<1x32xf32>
    %71 = vector.broadcast %70 : vector<1x32xf32> to vector<16x32xf32>
    %72 = arith.addf %69, %71 : vector<16x32xf32>
    %73 = arith.addf %72, %1 : vector<16x32xf32>
    %c0_28 = arith.constant 0 : index
    %c0_29 = arith.constant 0 : index
    %74 = vector.load %arg7[%c0_28, %c0_29] : memref<1x32xf32, #tpu.memory_space<vmem>>, vector<1x32xf32>
    %c0_30 = arith.constant 0 : index
    %c0_31 = arith.constant 0 : index
    %75 = vector.load %arg8[%c0_30, %c0_31] : memref<1x32xf32, #tpu.memory_space<vmem>>, vector<1x32xf32>
    %cst_32 = arith.constant dense<0.000000e+00> : vector<16xf32>
    %76 = vector.multi_reduction <add>, %73, %cst_32 [1] : vector<16x32xf32> to vector<16xf32>
    %77 = vector.shape_cast %76 : vector<16xf32> to vector<16x1xf32>
    %cst_33 = arith.constant 3.200000e+01 : f32
    %78 = vector.broadcast %cst_33 : f32 to vector<16x1xf32>
    %79 = arith.divf %77, %78 : vector<16x1xf32>
    %80 = vector.broadcast %79 : vector<16x1xf32> to vector<16x32xf32>
    %81 = arith.subf %73, %80 : vector<16x32xf32>
    %82 = arith.mulf %81, %81 : vector<16x32xf32>
    %cst_34 = arith.constant dense<0.000000e+00> : vector<16xf32>
    %83 = vector.multi_reduction <add>, %82, %cst_34 [1] : vector<16x32xf32> to vector<16xf32>
    %84 = vector.shape_cast %83 : vector<16xf32> to vector<16x1xf32>
    %cst_35 = arith.constant 3.200000e+01 : f32
    %85 = vector.broadcast %cst_35 : f32 to vector<16x1xf32>
    %86 = arith.divf %84, %85 : vector<16x1xf32>
    %cst_36 = arith.constant 9.99999996E-13 : f32
    %87 = vector.broadcast %cst_36 : f32 to vector<16x1xf32>
    %88 = arith.addf %86, %87 : vector<16x1xf32>
    %89 = math.rsqrt %88 : vector<16x1xf32>
    %90 = vector.broadcast %79 : vector<16x1xf32> to vector<16x32xf32>
    %91 = arith.subf %73, %90 : vector<16x32xf32>
    %92 = vector.broadcast %89 : vector<16x1xf32> to vector<16x32xf32>
    %93 = arith.mulf %91, %92 : vector<16x32xf32>
    %94 = vector.broadcast %74 : vector<1x32xf32> to vector<16x32xf32>
    %95 = arith.mulf %93, %94 : vector<16x32xf32>
    %96 = vector.broadcast %75 : vector<1x32xf32> to vector<16x32xf32>
    %97 = arith.addf %95, %96 : vector<16x32xf32>
    %98 = arith.truncf %97 : vector<16x32xf32> to vector<16x32xbf16>
    %c0_37 = arith.constant 0 : index
    %c0_38 = arith.constant 0 : index
    %99 = vector.load %arg9[%c0_37, %c0_38] : memref<32x128xbf16, #tpu.memory_space<vmem>>, vector<32x128xbf16>
    %cst_39 = arith.constant dense<0.000000e+00> : vector<16x128xf32>
    %100 = tpu.matmul %98, %99, %cst_39 {dimension_numbers = #tpu.dot_dimension_numbers<[1], [0], [0], [1], [0, 0, 1, 1], [], []>} : vector<16x32xbf16>, vector<32x128xbf16>, vector<16x128xf32> -> vector<16x128xf32>
    %c0_40 = arith.constant 0 : index
    %c0_41 = arith.constant 0 : index
    %101 = vector.load %arg10[%c0_40, %c0_41] : memref<1x128xf32, #tpu.memory_space<vmem>>, vector<1x128xf32>
    %102 = vector.broadcast %101 : vector<1x128xf32> to vector<16x128xf32>
    %103 = arith.addf %100, %102 : vector<16x128xf32>
    %cst_42 = arith.constant 5.000000e-01 : f32
    %104 = vector.broadcast %cst_42 : f32 to vector<16x128xf32>
    %105 = arith.mulf %104, %103 : vector<16x128xf32>
    %cst_43 = arith.constant 0.707106769 : f32
    %106 = vector.broadcast %cst_43 : f32 to vector<16x128xf32>
    %107 = arith.mulf %103, %106 : vector<16x128xf32>
    %108 = math.erf %107 : vector<16x128xf32>
    %cst_44 = arith.constant 1.000000e+00 : f32
    %109 = vector.broadcast %cst_44 : f32 to vector<16x128xf32>
    %110 = arith.addf %109, %108 : vector<16x128xf32>
    %111 = arith.mulf %105, %110 : vector<16x128xf32>
    %112 = arith.truncf %111 : vector<16x128xf32> to vector<16x128xbf16>
    %c0_45 = arith.constant 0 : index
    %c0_46 = arith.constant 0 : index
    %113 = vector.load %arg11[%c0_45, %c0_46] : memref<128x32xbf16, #tpu.memory_space<vmem>>, vector<128x32xbf16>
    %cst_47 = arith.constant dense<0.000000e+00> : vector<16x32xf32>
    %114 = tpu.matmul %112, %113, %cst_47 {dimension_numbers = #tpu.dot_dimension_numbers<[1], [0], [0], [1], [0, 0, 1, 1], [], []>} : vector<16x128xbf16>, vector<128x32xbf16>, vector<16x32xf32> -> vector<16x32xf32>
    %c0_48 = arith.constant 0 : index
    %c0_49 = arith.constant 0 : index
    %115 = vector.load %arg12[%c0_48, %c0_49] : memref<1x32xf32, #tpu.memory_space<vmem>>, vector<1x32xf32>
    %116 = vector.broadcast %115 : vector<1x32xf32> to vector<16x32xf32>
    %117 = arith.addf %114, %116 : vector<16x32xf32>
    %118 = arith.addf %117, %97 : vector<16x32xf32>
    %c0_50 = arith.constant 0 : index
    %c0_51 = arith.constant 0 : index
    %119 = vector.load %arg13[%c0_50, %c0_51] : memref<1x32xf32, #tpu.memory_space<vmem>>, vector<1x32xf32>
    %c0_52 = arith.constant 0 : index
    %c0_53 = arith.constant 0 : index
    %120 = vector.load %arg14[%c0_52, %c0_53] : memref<1x32xf32, #tpu.memory_space<vmem>>, vector<1x32xf32>
    %cst_54 = arith.constant dense<0.000000e+00> : vector<16xf32>
    %121 = vector.multi_reduction <add>, %118, %cst_54 [1] : vector<16x32xf32> to vector<16xf32>
    %122 = vector.shape_cast %121 : vector<16xf32> to vector<16x1xf32>
    %cst_55 = arith.constant 3.200000e+01 : f32
    %123 = vector.broadcast %cst_55 : f32 to vector<16x1xf32>
    %124 = arith.divf %122, %123 : vector<16x1xf32>
    %125 = vector.broadcast %124 : vector<16x1xf32> to vector<16x32xf32>
    %126 = arith.subf %118, %125 : vector<16x32xf32>
    %127 = arith.mulf %126, %126 : vector<16x32xf32>
    %cst_56 = arith.constant dense<0.000000e+00> : vector<16xf32>
    %128 = vector.multi_reduction <add>, %127, %cst_56 [1] : vector<16x32xf32> to vector<16xf32>
    %129 = vector.shape_cast %128 : vector<16xf32> to vector<16x1xf32>
    %cst_57 = arith.constant 3.200000e+01 : f32
    %130 = vector.broadcast %cst_57 : f32 to vector<16x1xf32>
    %131 = arith.divf %129, %130 : vector<16x1xf32>
    %cst_58 = arith.constant 9.99999996E-13 : f32
    %132 = vector.broadcast %cst_58 : f32 to vector<16x1xf32>
    %133 = arith.addf %131, %132 : vector<16x1xf32>
    %134 = math.rsqrt %133 : vector<16x1xf32>
    %135 = vector.broadcast %124 : vector<16x1xf32> to vector<16x32xf32>
    %136 = arith.subf %118, %135 : vector<16x32xf32>
    %137 = vector.broadcast %134 : vector<16x1xf32> to vector<16x32xf32>
    %138 = arith.mulf %136, %137 : vector<16x32xf32>
    %139 = vector.broadcast %119 : vector<1x32xf32> to vector<16x32xf32>
    %140 = arith.mulf %138, %139 : vector<16x32xf32>
    %141 = vector.broadcast %120 : vector<1x32xf32> to vector<16x32xf32>
    %142 = arith.addf %140, %141 : vector<16x32xf32>
    %143 = vector.shape_cast %142 : vector<16x32xf32> to vector<2x8x32xf32>
    %c0_59 = arith.constant 0 : index
    %c0_60 = arith.constant 0 : index
    %c0_61 = arith.constant 0 : index
    %144 = vector.load %arg15[%c0_59, %c0_60, %c0_61] : memref<2x8x32xf32, #tpu.memory_space<vmem>>, vector<2x8x32xf32>
    tpu.vector_store %arg15[%c0_59, %c0_60, %c0_61], %143 {strides = array<i32>} : memref<2x8x32xf32, #tpu.memory_space<vmem>>, vector<2x8x32xf32>,
    return
  }
  func.func @transform_0(%arg0: i32) -> (i32, i32, i32) {
    %c0_i32 = arith.constant 0 : i32
    %c0_i32_0 = arith.constant 0 : i32
    %c0_i32_1 = arith.constant 0 : i32
    %c0_i32_2 = arith.constant 0 : i32
    return %c0_i32, %c0_i32_0, %c0_i32_1 : i32, i32, i32
  }
  func.func @transform_1(%arg0: i32) -> (i32, i32, i32) {
    %c0_i32 = arith.constant 0 : i32
    %c0_i32_0 = arith.constant 0 : i32
    %c0_i32_1 = arith.constant 0 : i32
    %c0_i32_2 = arith.constant 0 : i32
    return %c0_i32, %c0_i32_0, %c0_i32_1 : i32, i32, i32
  }
  func.func @transform_2(%arg0: i32) -> (i32, i32) {
    %c0_i32 = arith.constant 0 : i32
    %c0_i32_0 = arith.constant 0 : i32
    %c0_i32_1 = arith.constant 0 : i32
    return %c0_i32, %c0_i32_0 : i32, i32
  }
  func.func @transform_3(%arg0: i32) -> (i32, i32) {
    %c0_i32 = arith.constant 0 : i32
    %c0_i32_0 = arith.constant 0 : i32
    %c0_i32_1 = arith.constant 0 : i32
    return %c0_i32, %c0_i32_0 : i32, i32
  }
  func.func @transform_4(%arg0: i32) -> (i32, i32, i32) {
    %c0_i32 = arith.constant 0 : i32
    %c0_i32_0 = arith.constant 0 : i32
    %c0_i32_1 = arith.constant 0 : i32
    %c0_i32_2 = arith.constant 0 : i32
    return %c0_i32, %c0_i32_0, %c0_i32_1 : i32, i32, i32
  }
  func.func @transform_5(%arg0: i32) -> (i32, i32) {
    %c0_i32 = arith.constant 0 : i32
    %c0_i32_0 = arith.constant 0 : i32
    %c0_i32_1 = arith.constant 0 : i32
    return %c0_i32, %c0_i32_0 : i32, i32
  }
  func.func @transform_6(%arg0: i32) -> (i32, i32) {
    %c0_i32 = arith.constant 0 : i32
    %c0_i32_0 = arith.constant 0 : i32
    %c0_i32_1 = arith.constant 0 : i32
    return %c0_i32, %c0_i32_0 : i32, i32
  }
  func.func @transform_7(%arg0: i32) -> (i32, i32) {
    %c0_i32 = arith.constant 0 : i32
    %c0_i32_0 = arith.constant 0 : i32
    %c0_i32_1 = arith.constant 0 : i32
    return %c0_i32, %c0_i32_0 : i32, i32
  }
  func.func @transform_8(%arg0: i32) -> (i32, i32) {
    %c0_i32 = arith.constant 0 : i32
    %c0_i32_0 = arith.constant 0 : i32
    %c0_i32_1 = arith.constant 0 : i32
    return %c0_i32, %c0_i32_0 : i32, i32
  }
  func.func @transform_9(%arg0: i32) -> (i32, i32) {
    %c0_i32 = arith.constant 0 : i32
    %c0_i32_0 = arith.constant 0 : i32
    %c0_i32_1 = arith.constant 0 : i32
    return %c0_i32, %c0_i32_0 : i32, i32
  }
  func.func @transform_10(%arg0: i32) -> (i32, i32) {
    %c0_i32 = arith.constant 0 : i32
    %c0_i32_0 = arith.constant 0 : i32
    %c0_i32_1 = arith.constant 0 : i32
    return %c0_i32, %c0_i32_0 : i32, i32
  }
  func.func @transform_11(%arg0: i32) -> (i32, i32) {
    %c0_i32 = arith.constant 0 : i32
    %c0_i32_0 = arith.constant 0 : i32
    %c0_i32_1 = arith.constant 0 : i32
    return %c0_i32, %c0_i32_0 : i32, i32
  }
  func.func @transform_12(%arg0: i32) -> (i32, i32) {
    %c0_i32 = arith.constant 0 : i32
    %c0_i32_0 = arith.constant 0 : i32
    %c0_i32_1 = arith.constant 0 : i32
    return %c0_i32, %c0_i32_0 : i32, i32
  }
  func.func @transform_13(%arg0: i32) -> (i32, i32) {
    %c0_i32 = arith.constant 0 : i32
    %c0_i32_0 = arith.constant 0 : i32
    %c0_i32_1 = arith.constant 0 : i32
    return %c0_i32, %c0_i32_0 : i32, i32
  }
  func.func @transform_14(%arg0: i32) -> (i32, i32, i32) {
    %c0_i32 = arith.constant 0 : i32
    %c0_i32_0 = arith.constant 0 : i32
    %c0_i32_1 = arith.constant 0 : i32
    %c0_i32_2 = arith.constant 0 : i32
    return %c0_i32, %c0_i32_0, %c0_i32_1 : i32, i32, i32
  }
}

</mosaic_0001>

<bundles_post_ra>
// kernel: bert_layer.1
= control target key start
LH: loop header
LB: loop body
LE: loop exit
PB: predicated region body
PF: predicated region fallthrough
CT: control target
= control target key end

     0   :  { %v1961_v1 = vmov 0.0   ;;  %vm1962_vm0 = vmmov 0   ;;  %vm75_vm1 = vcmask 261120   ;;  %s2404_s0 = inlined_call_operand.vmem [shape: f32[8,1,8], index: 0, kind: input, shape index: {}]   ;;  %s2405_s1 = inlined_call_operand.vmem [shape: f32[2,8,32], index: 1, kind: input, shape index: {}]   ;;  %s2406_s2 = inlined_call_operand.vmem [shape: bf16[32,96], index: 2, kind: input, shape index: {}]   ;;  %s2407_s3 = inlined_call_operand.vmem [shape: f32[1,96], index: 3, kind: input, shape index: {}]   ;;  %s2408_s4 = inlined_call_operand.vmem [shape: bf16[4,8,32], index: 4, kind: input, shape index: {}]   ;;  %s2409_s5 = inlined_call_operand.vmem [shape: f32[1,32], index: 5, kind: input, shape index: {}]   ;;  %s2410_s6 = inlined_call_operand.vmem [shape: f32[1,32], index: 6, kind: input, shape index: {}]   ;;  %s2411_s7 = inlined_call_operand.vmem [shape: f32[1,32], index: 7, kind: input, shape index: {}]   ;;  %s2412_s8 = inlined_call_operand.vmem [shape: bf16[32,128], index: 8, kind: input, shape index: {}]   ;;  %s2413_s9 = inlined_call_operand.vmem [shape: f32[1,128], index: 9, kind: input, shape index: {}]   ;;  %s2414_s10 = inlined_call_operand.vmem [shape: bf16[128,32], index: 10, kind: input, shape index: {}]   ;;  %s2415_s11 = inlined_call_operand.vmem [shape: f32[1,32], index: 11, kind: input, shape index: {}]   ;;  %s2416_s12 = inlined_call_operand.vmem [shape: f32[1,32], index: 12, kind: input, shape index: {}]   ;;  %s2417_s13 = inlined_call_operand.vmem [shape: f32[1,32], index: 13, kind: input, shape index: {}]   ;;  %s2418_s14 = inlined_call_operand.hbm [shape: f32[2,8,32], index: 14, kind: output, shape index: {}]  }
   0x1   :  { %v1881_v0 = vld [vmem:[%s2406_s2] sm:$0xff]   ;;  %1700 = vmatprep.subr.bf16.mxu1 %v1961_v1  ;;  %1726 = vmatprep.subr.bf16.mxu0 %v1961_v1  ;;  %v1882_v2 = vld [vmem:[%s2406_s2 + $0x8] sm:$0xff]  }
   0x2   :  { %1701 = vmatpush3.bf16.msra.mxu1 %v1881_v0  ;;  %1704 = vmatprep.mubr.msk.bf16.mxu1 %vm1962_vm0, %v1961_v1  ;;  %v2059_v3 = vld [vmem:[%s2405_s1] sm:$0xff]  ;;  %v2064_v4 = vld [vmem:[%s2405_s1 + $0x8] sm:$0xff] }
   0x3   :  { %1702 = vmatprep.subr.bf16.mxu1 %v1961_v1  ;;  %1728 = vmatprep.mubr.msk.bf16.mxu0 %vm1962_vm0, %v1961_v1  ;;  %v51_v5 = vpack.c.bf16 %v2064_v4, %v2059_v3 }
   0x6   :  { %1703 = vmatpush3.bf16.msra.mxu1 %v1882_v2 }
   0x7   :  { %1708 = vmatprep.subr.bf16.mxu1 %v1961_v1 }
   0x9   :  { %1705 = vmatmul.mubr.msk.bf16.vlgmr.msra.gmra.mrb[0].mxu1 %vm75_vm1, %v51_v5 }
   0xa   :  { %19 = vsyncpa [#allocation3], 0  ;;  %1710 = vmatprep.mubr.msk.bf16.mxu1 %vm1962_vm0, %v1961_v1  ;;  %v1592_v6 = vld [vmem:[%s2407_s3] ss:$0 sm:$0xff]  ;;  %s1963_s21 = smov 104   ;;  %s1964_s22 = smov 120  }
   0xb   :  { %s1965_s23 = smov 96   ;;  %s1966_s24 = smov 112   ;;  %vm207_vm2 = vcmask 64512   ;;  %vm698_vm3 = vcmask 1043456   ;;  %v1596_v51 = vld [vmem:[%s2404_s0] ss:$0 sm:$0xff] }
   0xc   :  { %s1967_s3 = smov 64   ;;  %v1597_v58 = vld [vmem:[%s2404_s0 + $0x1] ss:$0 sm:$0xff]  ;;  %v1598_v2 = vld [vmem:[%s2404_s0 + $0x2] ss:$0 sm:$0xff]  ;;  %s1968_s17 = smov [#allocation2]  }
   0xd   :  { %v1599_v5 = vld [vmem:[%s2404_s0 + $0x3] ss:$0 sm:$0xff]  ;;  %s1581_s18 = sshll.u32 %s1968_s17, 4  ;;  %s1582_s18 = int_to_ptr.vmem [resolvable:$true] %s1581_s18 }
   0xe   :  { %s1937_s19 = scalar_lea.vmem %s1582_s18, 256  ;;  %p1942_p1 = scmp.lt.s32.totalorder %s1582_s18, %s1582_s18 }
   0xf   :  { %p1938_p0 = scmp.ne.s32.totalorder %s1582_s18, %s1937_s19  ;;  %p1943_p2 = scmp.lt.s32.totalorder %s1937_s19, %s1937_s19 }
  0x11   :  { %p1944_p3 = por %p1943_p2, %p1942_p1 }
  0x13   :  { %p1945_p4 = pnand %p1944_p3, %p1938_p0 }
  0xdc   :  { %v113_v7 = vpop.f32.mrb[0].mxu1 }
  0xdd   :  { %v1706_v8 = vpop.f32.mrb[1].mxu1  ;;  %v114_v10 = vadd.f32 %v1592_v6, %v113_v7 }
  0xde   :  { %v116_v9 = vpop.f32.mrb[2].mxu1 }
  0xdf   :  { %v117_v11 = vadd.f32 %v1592_v6, %v116_v9  ;;  %v1707_v12 = vpop.f32.mrb[3].mxu1  ;;  %v140_v14 = vpack.c.bf16 %v114_v10, %v114_v10 }
  0xe1   :  { %v1876_v13 = vpack.i.bf16 %v117_v11, %v114_v10  ;;  %v141_v15 = vpack.c.bf16 %v117_v11, %v117_v11 }
  0xe3   :  { %1877 = vrot.lane.b32.xlu1 %v1876_v13, %s1963_s21  ;;  %1867 = vrot.lane.b32.xlu0 %v1876_v13, %s1964_s22 }
  0xe7   :  { %205 = vrot.lane.b32.xlu1 %v140_v14, %s1965_s23  ;;  %1872 = vrot.lane.b32.xlu0 %v1876_v13, %s1966_s24 }
  0xeb   :  { %255 = vrot.lane.b32.xlu0 %v141_v15, %s1965_s23 }
 0x155   :  { %v1878_v16 = vpop.permute.xlu1 %1877  ;;  %v1868_v17 = vpop.permute.xlu0 %1867 }
 0x156   :  { %v1870_v18 = vunpack.i.h.bf16 %v1868_v17  ;;  %v1869_v19 = vunpack.i.l.bf16 %v1868_v17  ;;  %v1879_v27 = vunpack.i.l.bf16 %v1878_v16  ;;  %v1880_v30 = vunpack.i.h.bf16 %v1878_v16 }
 0x158   :  { %v2080_v20 = vpack.c.bf16 %v1870_v18, %v1870_v18  ;;  %v2082_v21 = vpack.c.bf16 %v1869_v19, %v1869_v19  ;;  %v2098_v32 = vpack.c.bf16 %v1879_v27, %v1879_v27  ;;  %v2100_v33 = vpack.c.bf16 %v1880_v30, %v1880_v30  ;;  %v1600_v18 = vld [vmem:[%s2404_s0 + $0x4] ss:$0 sm:$0xff]  ;;  %v1601_v19 = vld [vmem:[%s2404_s0 + $0x5] ss:$0 sm:$0xff] }
 0x159   :  { %v206_v22 = vpop.permute.xlu1 %205  ;;  %v1873_v23 = vpop.permute.xlu0 %1872 }
 0x15a   :  { %v212_v24 = vsel %vm207_vm2, %v206_v22, 0  ;;  %v1875_v25 = vunpack.i.h.bf16 %v1873_v23  ;;  %v1874_v26 = vunpack.i.l.bf16 %v1873_v23  ;;  %304 = vrot.lane.b32.xlu1 %v2082_v21, %s1965_s23  ;;  %353 = vrot.lane.b32.xlu0 %v2080_v20, %s1965_s23 }
 0x15b   :  { %1709 = vmatpush3.bf16.xpose.msra.mxu1 %v212_v24 }
 0x15c   :  { %v2089_v28 = vpack.c.bf16 %v1875_v25, %v1875_v25  ;;  %v2091_v29 = vpack.c.bf16 %v1874_v26, %v1874_v26  ;;  %1714 = vmatprep.subr.bf16.mxu1 %v1961_v1 }
 0x15d   :  { %v256_v31 = vpop.permute.xlu0 %255 }
 0x15e   :  { %402 = vrot.lane.b32.xlu1 %v2091_v29, %s1965_s23  ;;  %451 = vrot.lane.b32.xlu0 %v2089_v28, %s1965_s23  ;;  %v261_v34 = vsel %vm207_vm2, %v256_v31, 0 }
 0x162   :  { %1711 = vmatmul.mubr.msk.bf16.vlgmr.msra.gmra.mrb[4].mxu1 %vm207_vm2, %v140_v14  ;;  %500 = vrot.lane.b32.xlu1 %v2098_v32, %s1965_s23 }
 0x163   :  { %549 = vrot.lane.b32.xlu0 %v2100_v33, %s1965_s23  ;;  %1715 = vmatpush3.bf16.xpose.msra.mxu1 %v261_v34 }
 0x164   :  { %1716 = vmatprep.mubr.msk.bf16.mxu1 %vm1962_vm0, %v1961_v1  ;;  %1720 = vmatprep.subr.bf16.mxu1 %v1961_v1 }
 0x166   :  { %742 = vrot.lane.b32.xlu1 %v141_v15, %s1967_s3 }
 0x167   :  { %693 = vrot.lane.b32.xlu0 %v140_v14, %s1967_s3 }
 0x16a   :  { %1717 = vmatmul.mubr.msk.bf16.vlgmr.msra.gmra.mrb[8].mxu1 %vm207_vm2, %v141_v15 }
 0x16b   :  { %1722 = vmatprep.mubr.msk.bf16.mxu1 %vm1962_vm0, %v1961_v1 }
 0x1cc   :  { %v305_v35 = vpop.permute.xlu1 %304  ;;  %v354_v36 = vpop.permute.xlu0 %353 }
 0x1cd   :  { %v310_v37 = vsel %vm207_vm2, %v305_v35, 0  ;;  %v359_v38 = vsel %vm207_vm2, %v354_v36, 0 }
 0x1ce   :  { %1721 = vmatpush3.bf16.xpose.msra.mxu1 %v310_v37  ;;  %1727 = vmatpush3.bf16.xpose.msra.mxu0 %v359_v38  ;;  %v1602_v38 = vld [vmem:[%s2404_s0 + $0x6] ss:$0 sm:$0xff] }
 0x1cf   :  { %1732 = vmatprep.subr.bf16.mxu1 %v1961_v1  ;;  %1738 = vmatprep.subr.bf16.mxu0 %v1961_v1 }
 0x1d0   :  { %v403_v39 = vpop.permute.xlu1 %402  ;;  %v452_v40 = vpop.permute.xlu0 %451 }
 0x1d1   :  { %v408_v41 = vsel %vm207_vm2, %v403_v39, 0  ;;  %v457_v42 = vsel %vm207_vm2, %v452_v40, 0  ;;  %v1603_v39 = vld [vmem:[%s2404_s0 + $0x7] ss:$0 sm:$0xff] }
 0x1d4   :  { %v501_v43 = vpop.permute.xlu1 %500 }
 0x1d5   :  { %1723 = vmatmul.mubr.msk.bf16.vlgmr.msra.gmra.mrb[12].mxu1 %vm207_vm2, %v2082_v21  ;;  %1729 = vmatmul.mubr.msk.bf16.vlgmr.msra.gmra.mrb[0].mxu0 %vm207_vm2, %v2080_v20  ;;  %v550_v44 = vpop.permute.xlu0 %549  ;;  %v506_v45 = vsel %vm207_vm2, %v501_v43, 0 }
 0x1d6   :  { %1733 = vmatpush3.bf16.xpose.msra.mxu1 %v408_v41  ;;  %1739 = vmatpush3.bf16.xpose.msra.mxu0 %v457_v42  ;;  %v555_v46 = vsel %vm207_vm2, %v550_v44, 0 }
 0x1d7   :  { %1734 = vmatprep.mubr.msk.bf16.mxu1 %vm1962_vm0, %v1961_v1  ;;  %1740 = vmatprep.mubr.msk.bf16.mxu0 %vm1962_vm0, %v1961_v1 }
 0x1d8   :  { %1744 = vmatprep.subr.bf16.mxu1 %v1961_v1  ;;  %1750 = vmatprep.subr.bf16.mxu0 %v1961_v1  ;;  %v743_v47 = vpop.permute.xlu1 %742 }
 0x1d9   :  { %v694_v48 = vpop.permute.xlu0 %693  ;;  %v748_v49 = vsel %vm698_vm3, %v743_v47, 0 }
 0x1da   :  { %v700_v50 = vsel %vm698_vm3, %v694_v48, 0 }
 0x1dd   :  { %1735 = vmatmul.mubr.msk.bf16.vlgmr.msra.gmra.mrb[16].mxu1 %vm207_vm2, %v2091_v29  ;;  %1741 = vmatmul.mubr.msk.bf16.vlgmr.msra.gmra.mrb[4].mxu0 %vm207_vm2, %v2089_v28 }
 0x1de   :  { %1745 = vmatpush3.bf16.xpose.msra.mxu1 %v506_v45  ;;  %1751 = vmatpush3.bf16.xpose.msra.mxu0 %v555_v46 }
 0x1df   :  { %1746 = vmatprep.mubr.msk.bf16.mxu1 %vm1962_vm0, %v1961_v1  ;;  %1752 = vmatprep.mubr.msk.bf16.mxu0 %vm1962_vm0, %v1961_v1 }
 0x1e0   :  { %1756 = vmatprep.subr.bf16.mxu1 %v1961_v1  ;;  %1762 = vmatprep.subr.bf16.mxu0 %v1961_v1 }
 0x1e5   :  { %1747 = vmatmul.mubr.msk.bf16.vlgmr.msra.gmra.mrb[20].mxu1 %vm207_vm2, %v2098_v32  ;;  %1753 = vmatmul.mubr.msk.bf16.vlgmr.msra.gmra.mrb[8].mxu0 %vm207_vm2, %v2100_v33 }
 0x1e6   :  { %1757 = vmatpush3.bf16.msra.mxu1 %v700_v50  ;;  %1763 = vmatpush3.bf16.msra.mxu0 %v748_v49 }
 0x1e7   :  { %1758 = vmatprep.mubr.msk.bf16.mxu1 %vm1962_vm0, %v1961_v1  ;;  %1764 = vmatprep.mubr.msk.bf16.mxu0 %vm1962_vm0, %v1961_v1 }
 0x1e8   :  { %1768 = vmatprep.subr.bf16.mxu1 %v1961_v1  ;;  %1774 = vmatprep.subr.bf16.mxu0 %v1961_v1 }
 0x235   :  { %v248_v52 = vpop.f32.mrb[4].mxu1 }
 0x236   :  { %v2159_v53 = vadd.f32 %v1596_v51, %v248_v52  ;;  %v1712_v54 = vpop.f32.mrb[5].mxu1 }
 0x237   :  { %v251_v55 = vpop.f32.mrb[6].mxu1 }
 0x238   :  { %v1713_v56 = vpop.f32.mrb[7].mxu1  ;;  %v597_v57 = vsel %vm207_vm2, %v2159_v53, -inf }
 0x239   :  { %598 = vmax.xlane.f32.xlu1 %v597_v57 }
 0x23d   :  { %v297_v59 = vpop.f32.mrb[8].mxu1 }
 0x23e   :  { %v298_v60 = vadd.f32 %v1597_v58, %v297_v59  ;;  %v1718_v61 = vpop.f32.mrb[9].mxu1 }
 0x23f   :  { %v300_v62 = vpop.f32.mrb[10].mxu1 }
 0x240   :  { %v1719_v63 = vpop.f32.mrb[11].mxu1  ;;  %v600_v0 = vsel %vm207_vm2, %v298_v60, -inf }
 0x241   :  { %601 = vmax.xlane.f32.xlu0 %v600_v0 }
 0x2a8   :  { %v346_v6 = vpop.f32.mrb[12].mxu1  ;;  %v395_v7 = vpop.f32.mrb[0].mxu0 }
 0x2a9   :  { %v2173_v8 = vadd.f32 %v1598_v2, %v346_v6  ;;  %v2175_v9 = vadd.f32 %v1599_v5, %v395_v7  ;;  %v1724_v10 = vpop.f32.mrb[13].mxu1  ;;  %v1730_v11 = vpop.f32.mrb[1].mxu0 }
 0x2aa   :  { %v349_v12 = vpop.f32.mrb[14].mxu1  ;;  %v398_v13 = vpop.f32.mrb[2].mxu0 }
 0x2ab   :  { %v1725_v14 = vpop.f32.mrb[15].mxu1  ;;  %v1731_v15 = vpop.f32.mrb[3].mxu0  ;;  %v606_v16 = vsel %vm207_vm2, %v2175_v9, -inf  ;;  %v603_v17 = vsel %vm207_vm2, %v2173_v8, -inf }
 0x2ac   :  { %607 = vmax.xlane.f32.xlu1 %v606_v16  ;;  %604 = vmax.xlane.f32.xlu0 %v603_v17 }
 0x2b0   :  { %v444_v22 = vpop.f32.mrb[16].mxu1  ;;  %v493_v23 = vpop.f32.mrb[4].mxu0 }
 0x2b1   :  { %v2187_v24 = vadd.f32 %v1600_v18, %v444_v22  ;;  %v494_v25 = vadd.f32 %v1601_v19, %v493_v23  ;;  %v1736_v26 = vpop.f32.mrb[17].mxu1  ;;  %v1742_v27 = vpop.f32.mrb[5].mxu0 }
 0x2b2   :  { %v447_v30 = vpop.f32.mrb[18].mxu1  ;;  %v496_v31 = vpop.f32.mrb[6].mxu0 }
 0x2b3   :  { %v1737_v34 = vpop.f32.mrb[19].mxu1  ;;  %v1743_v35 = vpop.f32.mrb[7].mxu0  ;;  %v612_v36 = vsel %vm207_vm2, %v494_v25, -inf  ;;  %v609_v37 = vsel %vm207_vm2, %v2187_v24, -inf }
 0x2b4   :  { %613 = vmax.xlane.f32.xlu1 %v612_v36  ;;  %610 = vmax.xlane.f32.xlu0 %v609_v37 }
 0x2b8   :  { %v542_v40 = vpop.f32.mrb[20].mxu1  ;;  %v591_v41 = vpop.f32.mrb[8].mxu0 }
 0x2b9   :  { %v2198_v42 = vadd.f32 %v1602_v38, %v542_v40  ;;  %v592_v43 = vadd.f32 %v1603_v39, %v591_v41  ;;  %v1748_v44 = vpop.f32.mrb[21].mxu1  ;;  %v1754_v45 = vpop.f32.mrb[9].mxu0 }
 0x2ba   :  { %v545_v46 = vpop.f32.mrb[22].mxu1  ;;  %v594_v47 = vpop.f32.mrb[10].mxu0 }
 0x2bb   :  { %v1749_v48 = vpop.f32.mrb[23].mxu1  ;;  %v1755_v49 = vpop.f32.mrb[11].mxu0  ;;  %v618_v50 = vsel %vm207_vm2, %v592_v43, -inf  ;;  %v615_v51 = vsel %vm207_vm2, %v2198_v42, -inf }
 0x2bc   :  { %619 = vmax.xlane.f32.xlu1 %v618_v50  ;;  %616 = vmax.xlane.f32.xlu0 %v615_v51 }
 0x2c6   :  { %v599_v52 = vpop.xlane.xlu1 %598 }
 0x2c7   :  { %v621_v55 = vsub.f32 %v2159_v53, %v599_v52 }
 0x2c9   :  { %v629_v57 = vmul.f32 1.442695, %v621_v55 }
 0x2cb   :  { %1893 = vpow2.f32 %v629_v57 }
 0x2cd   :  { %790 = vrot.lane.b32.xlu1 %v2082_v21, %s1967_s3 }
 0x2ce   :  { %v602_v54 = vpop.xlane.xlu0 %601 }
 0x2cf   :  { %v622_v56 = vsub.f32 %v298_v60, %v602_v54 }
 0x2d1   :  { %v631_v58 = vmul.f32 1.442695, %v622_v56 }
 0x2d2   :  { %838 = vrot.lane.b32.xlu0 %v2080_v20, %s1967_s3 }
 0x2d3   :  { %1895 = vpow2.f32 %v631_v58 }
 0x2d5   :  { %v1894_v59 = vpop.eup %1893 }
 0x2d6   :  { %v645_v63 = vsel %vm207_vm2, %v1894_v59, 0.0 }
 0x2dd   :  { %v1896_v61 = vpop.eup %1895 }
 0x2de   :  { %v648_v62 = vsel %vm207_vm2, %v1896_v61, 0.0 }
 0x2f1   :  { %649 = vadd.xlane.f32.xlu1 %v648_v62  ;;  %646 = vadd.xlane.f32.xlu0 %v645_v63 }
 0x302   :  { %886 = vrot.lane.b32.xlu1 %v2091_v29, %s1967_s3 }
 0x339   :  { %v608_v20 = vpop.xlane.xlu1 %607  ;;  %v605_v21 = vpop.xlane.xlu0 %604 }
 0x33a   :  { %v624_v53 = vsub.f32 %v2175_v9, %v608_v20  ;;  %v623_v60 = vsub.f32 %v2173_v8, %v605_v21 }
 0x33c   :  { %v635_v0 = vmul.f32 1.442695, %v624_v53  ;;  %v633_v2 = vmul.f32 1.442695, %v623_v60  ;;  %v1079_v60 = vld [vmem:[%s2408_s4] sm:$0xf] }
 0x33e   :  { %1897 = vpow2.f32 %v635_v0 }
 0x33f   :  { %1899 = vpow2.f32 %v633_v2 }
 0x341   :  { %v614_v5 = vpop.xlane.xlu1 %613  ;;  %v611_v18 = vpop.xlane.xlu0 %610 }
 0x342   :  { %v626_v6 = vsub.f32 %v494_v25, %v614_v5  ;;  %v625_v19 = vsub.f32 %v2187_v24, %v611_v18 }
 0x344   :  { %v639_v7 = vmul.f32 1.442695, %v626_v6  ;;  %v637_v23 = vmul.f32 1.442695, %v625_v19  ;;  %v1134_v6 = vsel %vm698_vm3, %v1079_v60, 0 }
 0x346   :  { %1901 = vpow2.f32 %v639_v7 }
 0x348   :  { %v2214_v10 = vpop.eup %1897 }
 0x349   :  { %v2216_v11 = vpop.eup %1899  ;;  %v620_v12 = vpop.xlane.xlu1 %619  ;;  %v654_v29 = vsel %vm207_vm2, %v2214_v10, 0.0 }
 0x34a   :  { %v628_v13 = vsub.f32 %v592_v43, %v620_v12  ;;  %655 = vadd.xlane.f32.xlu1 %v654_v29  ;;  %v651_v8 = vsel %vm207_vm2, %v2216_v11, 0.0  ;;  %v617_v22 = vpop.xlane.xlu0 %616 }
 0x34b   :  { %652 = vadd.xlane.f32.xlu0 %v651_v8  ;;  %v627_v25 = vsub.f32 %v2198_v42, %v617_v22 }
 0x34c   :  { %v643_v9 = vmul.f32 1.442695, %v628_v13 }
 0x34d   :  { %v641_v26 = vmul.f32 1.442695, %v627_v25  ;;  %v791_v27 = vpop.permute.xlu1 %790 }
 0x34e   :  { %1903 = vpow2.f32 %v643_v9  ;;  %v839_v30 = vpop.permute.xlu0 %838  ;;  %v796_v43 = vsel %vm698_vm3, %v791_v27, 0  ;;  %v1620_v9 = vld [vmem:[%s2408_s4 + $0x4] sm:$0xf]  ;;  %v1625_v27 = vld [vmem:[%s2408_s4 + $0xc] sm:$0xf] }
 0x34f   :  { %1905 = vpow2.f32 %v637_v23  ;;  %v844_v42 = vsel %vm698_vm3, %v839_v30, 0  ;;  %v1236_v30 = vsel %vm698_vm3, %v1625_v27, 0 }
 0x350   :  { %v2222_v14 = vpop.eup %1901  ;;  %1907 = vpow2.f32 %v641_v26 }
 0x351   :  { %v660_v15 = vsel %vm207_vm2, %v2222_v14, 0.0 }
 0x352   :  { %661 = vadd.xlane.f32.xlu1 %v660_v15 }
 0x358   :  { %v2226_v16 = vpop.eup %1903 }
 0x359   :  { %v666_v17 = vsel %vm207_vm2, %v2226_v16, 0.0  ;;  %v2236_v31 = vpop.eup %1905 }
 0x35a   :  { %667 = vadd.xlane.f32.xlu1 %v666_v17  ;;  %v2240_v24 = vpop.eup %1907 }
 0x361   :  { %934 = vrot.lane.b32.xlu0 %v2089_v28, %s1967_s3  ;;  %v657_v28 = vsel %vm207_vm2, %v2236_v31, 0.0 }
 0x36b   :  { %982 = vrot.lane.b32.xlu1 %v2098_v32, %s1967_s3  ;;  %v663_v32 = vsel %vm207_vm2, %v2240_v24, 0.0 }
 0x37e   :  { %v650_v34 = vpop.xlane.xlu1 %649  ;;  %v647_v35 = vpop.xlane.xlu0 %646 }
 0x37f   :  { %1909 = vrcp.f32 %v650_v34 }
 0x380   :  { %1911 = vrcp.f32 %v647_v35  ;;  %658 = vadd.xlane.f32.xlu0 %v657_v28 }
 0x382   :  { %v887_v44 = vpop.permute.xlu1 %886 }
 0x384   :  { %664 = vadd.xlane.f32.xlu0 %v663_v32 }
 0x389   :  { %v1910_v36 = vpop.eup %1909 }
 0x38a   :  { %v1912_v37 = vpop.eup %1911  ;;  %v678_v38 = vmul.f32 %v1910_v36, %v1896_v61 }
 0x38b   :  { %v677_v39 = vmul.f32 %v1912_v37, %v1894_v59 }
 0x38c   :  { %v686_v40 = vpack.c.bf16 %v678_v38, %v678_v38 }
 0x38d   :  { %v685_v41 = vpack.c.bf16 %v677_v39, %v677_v39 }
 0x38e   :  { %1765 = vmatmul.mubr.msk.bf16.vlgmr.msra.gmra.mrb[12].mxu0 %vm207_vm2, %v686_v40 }
 0x38f   :  { %1759 = vmatmul.mubr.msk.bf16.vlgmr.msra.gmra.mrb[24].mxu1 %vm207_vm2, %v685_v41  ;;  %1775 = vmatpush3.bf16.msra.mxu0 %v844_v42 }
 0x390   :  { %1769 = vmatpush3.bf16.msra.mxu1 %v796_v43  ;;  %1770 = vmatprep.mubr.msk.bf16.mxu1 %vm1962_vm0, %v1961_v1 }
 0x391   :  { %1776 = vmatprep.mubr.msk.bf16.mxu0 %vm1962_vm0, %v1961_v1  ;;  %1780 = vmatprep.subr.bf16.mxu1 %v1961_v1 }
 0x392   :  { %1786 = vmatprep.subr.bf16.mxu0 %v1961_v1 }
 0x39a   :  { %1030 = vrot.lane.b32.xlu0 %v2100_v33, %s1967_s3  ;;  %v892_v33 = vsel %vm698_vm3, %v887_v44, 0 }
 0x3d7   :  { %v656_v45 = vpop.xlane.xlu1 %655 }
 0x3d8   :  { %1913 = vrcp.f32 %v656_v45  ;;  %v653_v46 = vpop.xlane.xlu0 %652 }
 0x3d9   :  { %1915 = vrcp.f32 %v653_v46 }
 0x3dc   :  { %v935_v52 = vpop.permute.xlu0 %934 }
 0x3dd   :  { %v940_v56 = vsel %vm698_vm3, %v935_v52, 0 }
 0x3df   :  { %v662_v47 = vpop.xlane.xlu1 %661 }
 0x3e0   :  { %1917 = vrcp.f32 %v662_v47 }
 0x3e2   :  { %v1914_v48 = vpop.eup %1913 }
 0x3e3   :  { %v1916_v49 = vpop.eup %1915  ;;  %v680_v50 = vmul.f32 %v1914_v48, %v2214_v10 }
 0x3e4   :  { %v679_v51 = vmul.f32 %v1916_v49, %v2216_v11 }
 0x3e5   :  { %v688_v54 = vpack.c.bf16 %v680_v50, %v680_v50 }
 0x3e6   :  { %v687_v55 = vpack.c.bf16 %v679_v51, %v679_v51 }
 0x3e7   :  { %1777 = vmatmul.mubr.msk.bf16.vlgmr.msra.gmra.mrb[16].mxu0 %vm207_vm2, %v688_v54  ;;  %v668_v61 = vpop.xlane.xlu1 %667 }
 0x3e8   :  { %1771 = vmatmul.mubr.msk.bf16.vlgmr.msra.gmra.mrb[28].mxu1 %vm207_vm2, %v687_v55  ;;  %1787 = vmatpush3.bf16.msra.mxu0 %v940_v56  ;;  %1919 = vrcp.f32 %v668_v61 }
 0x3e9   :  { %1781 = vmatpush3.bf16.msra.mxu1 %v892_v33  ;;  %1788 = vmatprep.mubr.msk.bf16.mxu0 %vm1962_vm0, %v1961_v1 }
 0x3ea   :  { %v1918_v57 = vpop.eup %1917  ;;  %1798 = vmatprep.subr.bf16.mxu0 %v1961_v1  ;;  %1782 = vmatprep.mubr.msk.bf16.mxu1 %vm1962_vm0, %v1961_v1 }
 0x3eb   :  { %v682_v58 = vmul.f32 %v1918_v57, %v2222_v14  ;;  %1792 = vmatprep.subr.bf16.mxu1 %v1961_v1  ;;  %v983_v10 = vpop.permute.xlu1 %982  ;;  %v1087_v14 = vsel %vm698_vm3, %v1620_v9, 0 }
 0x3ec   :  { %v988_v29 = vsel %vm698_vm3, %v983_v10, 0 }
 0x3ed   :  { %v690_v59 = vpack.c.bf16 %v682_v58, %v682_v58 }
 0x3ef   :  { %1789 = vmatmul.mubr.msk.bf16.vlgmr.msra.gmra.mrb[20].mxu0 %vm207_vm2, %v690_v59 }
 0x3f0   :  { %1800 = vmatprep.mubr.msk.bf16.mxu0 %vm1962_vm0, %v1961_v1 }
 0x3f2   :  { %v1920_v63 = vpop.eup %1919 }
 0x3f3   :  { %v684_v21 = vmul.f32 %v1920_v63, %v2226_v16 }
 0x3f5   :  { %v692_v5 = vpack.c.bf16 %v684_v21, %v684_v21 }
 0x40d   :  { %v659_v62 = vpop.xlane.xlu0 %658 }
 0x40e   :  { %1921 = vrcp.f32 %v659_v62 }
 0x411   :  { %v665_v20 = vpop.xlane.xlu0 %664 }
 0x412   :  { %1923 = vrcp.f32 %v665_v20 }
 0x415   :  { %v1031_v53 = vpop.permute.xlu0 %1030 }
 0x416   :  { %v1036_v0 = vsel %vm698_vm3, %v1031_v53, 0 }
 0x417   :  { %1799 = vmatpush3.bf16.msra.mxu0 %v1036_v0 }
 0x418   :  { %v1922_v2 = vpop.eup %1921  ;;  %1810 = vmatprep.subr.bf16.mxu0 %v1961_v1 }
 0x419   :  { %v681_v7 = vmul.f32 %v1922_v2, %v2236_v31  ;;  %v1623_v31 = vld [vmem:[%s2408_s4 + $0x8] sm:$0xf] }
 0x41a   :  { %1801 = vmatmul.mubr.msk.bf16.vlgmr.msra.gmra.mrb[24].mxu0 %vm207_vm2, %v692_v5  ;;  %v1184_v37 = vsel %vm698_vm3, %v1623_v31, 0 }
 0x41b   :  { %v689_v11 = vpack.c.bf16 %v681_v7, %v681_v7  ;;  %1811 = vmatpush3.bf16.msra.mxu0 %v1134_v6  ;;  %1812 = vmatprep.mubr.msk.bf16.mxu0 %vm1962_vm0, %v1961_v1 }
 0x41c   :  { %v1924_v12 = vpop.eup %1923  ;;  %1822 = vmatprep.subr.bf16.mxu0 %v1961_v1 }
 0x41d   :  { %1783 = vmatmul.mubr.msk.bf16.vlgmr.msra.gmra.mrb[32].mxu1 %vm207_vm2, %v689_v11  ;;  %v683_v13 = vmul.f32 %v1924_v12, %v2240_v24 }
 0x41e   :  { %1793 = vmatpush3.bf16.msra.mxu1 %v988_v29  ;;  %1794 = vmatprep.mubr.msk.bf16.mxu1 %vm1962_vm0, %v1961_v1 }
 0x41f   :  { %1804 = vmatprep.subr.bf16.mxu1 %v1961_v1  ;;  %v691_v8 = vpack.c.bf16 %v683_v13, %v683_v13  ;;  %v1627_v13 = vld [vmem:[%s2409_s5] ss:$0 sm:$0xff] }
 0x425   :  { %1795 = vmatmul.mubr.msk.bf16.vlgmr.msra.gmra.mrb[36].mxu1 %vm207_vm2, %v691_v8 }
 0x426   :  { %1806 = vmatprep.mubr.msk.bf16.mxu1 %vm1962_vm0, %v1961_v1  ;;  %1805 = vmatpush3.bf16.msra.mxu1 %v1087_v14 }
 0x427   :  { %1816 = vmatprep.subr.bf16.mxu1 %v1961_v1 }
 0x461   :  { %v784_v15 = vpop.f32.mrb[12].mxu0 }
 0x462   :  { %v736_v16 = vpop.f32.mrb[24].mxu1  ;;  %v1766_v17 = vpop.f32.mrb[13].mxu0 }
 0x463   :  { %v1078_v18 = vpack.c.bf16 %v784_v15, %v736_v16  ;;  %v1760_v19 = vpop.f32.mrb[25].mxu1  ;;  %v787_v22 = vpop.f32.mrb[14].mxu0 }
 0x464   :  { %v739_v23 = vpop.f32.mrb[26].mxu1  ;;  %v1767_v25 = vpop.f32.mrb[15].mxu0 }
 0x465   :  { %v1761_v26 = vpop.f32.mrb[27].mxu1  ;;  %1813 = vmatmul.mubr.msk.bf16.vlgmr.msra.gmra.mrb[28].mxu0 %vm207_vm2, %v1078_v18 }
 0x466   :  { %1824 = vmatprep.mubr.msk.bf16.mxu0 %vm1962_vm0, %v1961_v1  ;;  %1823 = vmatpush3.bf16.msra.mxu0 %v1236_v30 }
 0x467   :  { %1836 = vmatprep.subr.bf16.mxu0 %v1961_v1 }
 0x4ba   :  { %v880_v34 = vpop.f32.mrb[16].mxu0 }
 0x4bb   :  { %v832_v35 = vpop.f32.mrb[28].mxu1  ;;  %v1778_v28 = vpop.f32.mrb[17].mxu0 }
 0x4bc   :  { %v1080_v24 = vpack.c.bf16 %v880_v34, %v832_v35  ;;  %v1772_v32 = vpop.f32.mrb[29].mxu1  ;;  %v883_v36 = vpop.f32.mrb[18].mxu0 }
 0x4bd   :  { %v835_v38 = vpop.f32.mrb[30].mxu1  ;;  %v1779_v39 = vpop.f32.mrb[19].mxu0  ;;  %v1884_v36 = vld [vmem:[%s2412_s8 + $0x8] sm:$0xff]  }
 0x4be   :  { %v1773_v40 = vpop.f32.mrb[31].mxu1  ;;  %1807 = vmatmul.mubr.msk.bf16.vlgmr.msra.gmra.mrb[40].mxu1 %vm207_vm2, %v1080_v24  ;;  %v1886_v38 = vld [vmem:[%s2414_s10 + $0x8] sm:$0xff]  }
 0x4bf   :  { %1817 = vmatpush3.bf16.msra.mxu1 %v1184_v37  ;;  %1818 = vmatprep.mubr.msk.bf16.mxu1 %vm1962_vm0, %v1961_v1  ;;  %v1885_v37 = vld [vmem:[%s2414_s10] sm:$0xff]  }
 0x4c0   :  { %1828 = vmatprep.subr.bf16.mxu1 %v1961_v1 }
 0x4c2   :  { %v976_v41 = vpop.f32.mrb[20].mxu0 }
 0x4c3   :  { %v1790_v42 = vpop.f32.mrb[21].mxu0 }
 0x4c4   :  { %v979_v43 = vpop.f32.mrb[22].mxu0 }
 0x4c5   :  { %v1791_v44 = vpop.f32.mrb[23].mxu0 }
 0x4ed   :  { %v1072_v45 = vpop.f32.mrb[24].mxu0 }
 0x4ee   :  { %v1802_v46 = vpop.f32.mrb[25].mxu0 }
 0x4ef   :  { %v1075_v47 = vpop.f32.mrb[26].mxu0  ;;  %v1628_v46 = vld [vmem:[%s2410_s6] ss:$0 sm:$0xff] }
 0x4f0   :  { %v928_v48 = vpop.f32.mrb[32].mxu1  ;;  %v1803_v49 = vpop.f32.mrb[27].mxu0 }
 0x4f1   :  { %v1177_v50 = vpack.c.bf16 %v976_v41, %v928_v48  ;;  %v1784_v51 = vpop.f32.mrb[33].mxu1 }
 0x4f2   :  { %v931_v52 = vpop.f32.mrb[34].mxu1  ;;  %v1629_v51 = vld [vmem:[%s2411_s7] ss:$0 sm:$0xff] }
 0x4f3   :  { %v1785_v54 = vpop.f32.mrb[35].mxu1  ;;  %1819 = vmatmul.mubr.msk.bf16.vlgmr.msra.gmra.mrb[44].mxu1 %vm207_vm2, %v1177_v50 }
 0x4f4   :  { %1832 = vmatprep.mubr.msk.bf16.mxu1 %vm1962_vm0, %v1961_v1 }
 0x4f8   :  { %v1024_v55 = vpop.f32.mrb[36].mxu1 }
 0x4f9   :  { %v1229_v56 = vpack.c.bf16 %v1072_v45, %v1024_v55  ;;  %v1796_v33 = vpop.f32.mrb[37].mxu1 }
 0x4fa   :  { %v1027_v57 = vpop.f32.mrb[38].mxu1  ;;  %v1887_v33 = vld [vmem:[%s2414_s10 + $0x10] sm:$0xff]  }
 0x4fb   :  { %v1797_v58 = vpop.f32.mrb[39].mxu1  ;;  %1825 = vmatmul.mubr.msk.bf16.vlgmr.msra.gmra.mrb[32].mxu0 %vm207_vm2, %v1229_v56  ;;  %v1888_v57 = vld [vmem:[%s2414_s10 + $0x18] sm:$0xff]  }
 0x4fc   :  { %1852 = vmatprep.mubr.msk.bf16.mxu0 %vm1962_vm0, %v1961_v1  ;;  %1837 = vmatpush3.bf16.msra.mxu0 %v1885_v37  ;;  %v1889_v58 = vld [vmem:[%s2414_s10 + $0x20] sm:$0xff]  }
 0x4fd   :  { %1838 = vmatprep.subr.bf16.mxu0 %v1961_v1 }
 0x500   :  { %1839 = vmatpush3.bf16.msra.mxu0 %v1886_v38 }
 0x501   :  { %1840 = vmatprep.subr.bf16.mxu0 %v1961_v1 }
 0x504   :  { %1841 = vmatpush3.bf16.msra.mxu0 %v1887_v33 }
 0x505   :  { %1842 = vmatprep.subr.bf16.mxu0 %v1961_v1 }
 0x508   :  { %1843 = vmatpush3.bf16.msra.mxu0 %v1888_v57 }
 0x509   :  { %1844 = vmatprep.subr.bf16.mxu0 %v1961_v1 }
 0x50c   :  { %1845 = vmatpush3.bf16.msra.mxu0 %v1889_v58 }
 0x50d   :  { %1846 = vmatprep.subr.bf16.mxu0 %v1961_v1 }
 0x538   :  { %v1170_v59 = vpop.f32.mrb[28].mxu0 }
 0x539   :  { %v1814_v61 = vpop.f32.mrb[29].mxu0 }
 0x53a   :  { %v1173_v62 = vpop.f32.mrb[30].mxu0  ;;  %v1891_v61 = vld [vmem:[%s2414_s10 + $0x30] sm:$0xff]  }
 0x53b   :  { %v1815_v63 = vpop.f32.mrb[31].mxu0 }
 0x53c   :  { %v1630_v63 = vld [vmem:[%s2413_s9] ss:$0 sm:$0xff] }
 0x591   :  { %v1123_v20 = vpop.f32.mrb[40].mxu1 }
 0x592   :  { %v1171_v21 = vadd.f32 %v1170_v59, %v1123_v20  ;;  %v1808_v53 = vpop.f32.mrb[41].mxu1  ;;  %v1890_v59 = vld [vmem:[%s2414_s10 + $0x28] sm:$0xff]  }
 0x593   :  { %v1126_v60 = vpop.f32.mrb[42].mxu1  ;;  %1847 = vmatpush3.bf16.msra.mxu0 %v1890_v59 }
 0x594   :  { %v1174_v0 = vadd.f32 %v1173_v62, %v1126_v60  ;;  %v1809_v2 = vpop.f32.mrb[43].mxu1  ;;  %1848 = vmatprep.subr.bf16.mxu0 %v1961_v1  ;;  %v1892_v62 = vld [vmem:[%s2414_s10 + $0x38] sm:$0xff]  }
 0x597   :  { %1849 = vmatpush3.bf16.msra.mxu0 %v1891_v61 }
 0x598   :  { %1850 = vmatprep.subr.bf16.mxu0 %v1961_v1 }
 0x59b   :  { %1851 = vmatpush3.bf16.msra.mxu0 %v1892_v62 }
 0x5c6   :  { %v1220_v5 = vpop.f32.mrb[44].mxu1 }
 0x5c7   :  { %v1227_v6 = vadd.f32 %v1220_v5, %v1171_v21  ;;  %v1820_v7 = vpop.f32.mrb[45].mxu1 }
 0x5c8   :  { %v1223_v10 = vpop.f32.mrb[46].mxu1 }
 0x5c9   :  { %v1228_v11 = vadd.f32 %v1223_v10, %v1174_v0  ;;  %v1821_v12 = vpop.f32.mrb[47].mxu1 }
 0x5ce   :  { %v1272_v29 = vpop.f32.mrb[32].mxu0 }
 0x5cf   :  { %v1279_v8 = vadd.f32 %v1272_v29, %v1227_v6  ;;  %v1826_v9 = vpop.f32.mrb[33].mxu0 }
 0x5d0   :  { %v1275_v14 = vpop.f32.mrb[34].mxu0 }
 0x5d1   :  { %v1288_v15 = vadd.f32 %v1627_v13, %v1279_v8  ;;  %v1280_v16 = vadd.f32 %v1275_v14, %v1228_v11  ;;  %v1827_v17 = vpop.f32.mrb[35].mxu0  ;;  %v1634_v14 = vld [vmem:[%s2415_s11] ss:$0 sm:$0xff] }
 0x5d3   :  { %v1289_v18 = vadd.f32 %v1627_v13, %v1280_v16  ;;  %v1290_v19 = vadd.f32 %v1288_v15, %v2059_v3 }
 0x5d5   :  { %v1294_v22 = vsel %vm75_vm1, %v1290_v19, 0.0  ;;  %v1291_v23 = vadd.f32 %v1289_v18, %v2064_v4  ;;  %v1883_v4 = vld [vmem:[%s2412_s8] sm:$0xff]  }
 0x5d6   :  { %1295 = vadd.xlane.f32.xlu1 %v1294_v22  ;;  %1829 = vmatpush3.bf16.msra.mxu1 %v1883_v4 }
 0x5d7   :  { %v1297_v25 = vsel %vm75_vm1, %v1291_v23, 0.0  ;;  %1830 = vmatprep.subr.bf16.mxu1 %v1961_v1 }
 0x5d8   :  { %1298 = vadd.xlane.f32.xlu0 %v1297_v25 }
 0x5da   :  { %1831 = vmatpush3.bf16.msra.mxu1 %v1884_v36 }
 0x663   :  { %v1296_v26 = vpop.xlane.xlu1 %1295 }
 0x664   :  { %v1301_v27 = vmul.f32 0.03125, %v1296_v26 }
 0x665   :  { %v1299_v30 = vpop.xlane.xlu0 %1298 }
 0x666   :  { %v1303_v31 = vsub.f32 %v1290_v19, %v1301_v27  ;;  %v1302_v34 = vmul.f32 0.03125, %v1299_v30 }
 0x668   :  { %v1304_v35 = vsub.f32 %v1291_v23, %v1302_v34  ;;  %v1305_v28 = vmul.f32 %v1303_v31, %v1303_v31 }
 0x66a   :  { %v1307_v24 = vsel %vm75_vm1, %v1305_v28, 0.0  ;;  %v1306_v32 = vmul.f32 %v1304_v35, %v1304_v35 }
 0x66b   :  { %1308 = vadd.xlane.f32.xlu0 %v1307_v24 }
 0x66c   :  { %v1310_v3 = vsel %vm75_vm1, %v1306_v32, 0.0 }
 0x66d   :  { %1311 = vadd.xlane.f32.xlu1 %v1310_v3 }
 0x6f8   :  { %v1309_v39 = vpop.xlane.xlu0 %1308 }
 0x6f9   :  { %v1313_v40 = vmul.f32 0.03125, %v1309_v39 }
 0x6fa   :  { %v1312_v41 = vpop.xlane.xlu1 %1311 }
 0x6fb   :  { %v1315_v42 = vadd.f32 1e-12, %v1313_v40  ;;  %v1314_v43 = vmul.f32 0.03125, %v1312_v41 }
 0x6fd   :  { %1925 = vrsqrt.f32 %v1315_v42  ;;  %v1316_v44 = vadd.f32 1e-12, %v1314_v43 }
 0x6ff   :  { %1927 = vrsqrt.f32 %v1316_v44  ;;  %v1643_v44 = vld [vmem:[%s2416_s12] ss:$0 sm:$0xff] }
 0x707   :  { %v1926_v45 = vpop.eup %1925 }
 0x708   :  { %v1319_v47 = vmul.f32 %v1926_v45, %v1303_v31 }
 0x709   :  { %v1928_v48 = vpop.eup %1927 }
 0x70a   :  { %v1327_v49 = vmul.f32 %v1628_v46, %v1319_v47  ;;  %v1320_v50 = vmul.f32 %v1928_v48, %v1304_v35  ;;  %v1644_v47 = vld [vmem:[%s2417_s13] ss:$0 sm:$0xff] }
 0x70c   :  { %v1328_v52 = vmul.f32 %v1628_v46, %v1320_v50  ;;  %v1335_v54 = vadd.f32 %v1629_v51, %v1327_v49 }
 0x70e   :  { %v1336_v55 = vadd.f32 %v1629_v51, %v1328_v52 }
 0x710   :  { %v1337_v56 = vpack.c.bf16 %v1336_v55, %v1335_v54 }
 0x712   :  { %1833 = vmatmul.mubr.msk.bf16.vlgmr.msra.gmra.mrb[48].mxu1 %vm75_vm1, %v1337_v56 }
 0x7e5   :  { %v1398_v20 = vpop.f32.mrb[48].mxu1 }
 0x7e6   :  { %v1399_v21 = vadd.f32 %v1630_v63, %v1398_v20  ;;  %v1834_v53 = vpop.f32.mrb[49].mxu1 }
 0x7e7   :  { %v1401_v60 = vpop.f32.mrb[50].mxu1 }
 0x7e8   :  { %v1407_v0 = vmul.f32 0.70710677, %v1399_v21  ;;  %v1402_v2 = vadd.f32 %v1630_v63, %v1401_v60  ;;  %v1835_v5 = vpop.f32.mrb[51].mxu1  ;;  %v1405_v11 = vmul.f32 0.5, %v1399_v21 }
 0x7ea   :  { %1929 = verf.f32 %v1407_v0  ;;  %v1408_v6 = vmul.f32 0.70710677, %v1402_v2  ;;  %v1406_v12 = vmul.f32 0.5, %v1402_v2 }
 0x7ec   :  { %1931 = verf.f32 %v1408_v6 }
 0x7f4   :  { %v1930_v1 = vpop.eup %1929 }
 0x7f5   :  { %v1411_v7 = vadd.f32 1.0, %v1930_v1 }
 0x7f6   :  { %v1932_v10 = vpop.eup %1931 }
 0x7f7   :  { %v1412_v29 = vadd.f32 1.0, %v1932_v10  ;;  %v1413_v13 = vmul.f32 %v1411_v7, %v1405_v11 }
 0x7f9   :  { %v1414_v8 = vmul.f32 %v1412_v29, %v1406_v12 }
 0x7fb   :  { %v1415_v9 = vpack.c.bf16 %v1414_v8, %v1413_v13 }
 0x7fd   :  { %1853 = vmatmul.mubr.bf16.vlgmr.msra.gmra.mrb[36].mxu0 %v1415_v9 }
 0x8d0   :  { %v1521_v15 = vpop.f32.mrb[36].mxu0 }
 0x8d1   :  { %v1522_v16 = vadd.f32 %v1634_v14, %v1521_v15  ;;  %v1854_v17 = vpop.f32.mrb[37].mxu0 }
 0x8d2   :  { %v1524_v18 = vpop.f32.mrb[38].mxu0 }
 0x8d3   :  { %v1525_v19 = vadd.f32 %v1634_v14, %v1524_v18  ;;  %v1855_v22 = vpop.f32.mrb[39].mxu0  ;;  %v1528_v23 = vadd.f32 %v1522_v16, %v1335_v54 }
 0x8d5   :  { %v1532_v25 = vsel %vm75_vm1, %v1528_v23, 0.0  ;;  %v1529_v26 = vadd.f32 %v1525_v19, %v1336_v55 }
 0x8d6   :  { %1533 = vadd.xlane.f32.xlu0 %v1532_v25 }
 0x8d7   :  { %v1535_v27 = vsel %vm75_vm1, %v1529_v26, 0.0 }
 0x8d8   :  { %1536 = vadd.xlane.f32.xlu1 %v1535_v27 }
 0x963   :  { %v1534_v30 = vpop.xlane.xlu0 %1533 }
 0x964   :  { %v1538_v31 = vmul.f32 0.03125, %v1534_v30 }
 0x965   :  { %v1537_v34 = vpop.xlane.xlu1 %1536 }
 0x966   :  { %v1540_v35 = vsub.f32 %v1528_v23, %v1538_v31  ;;  %v1539_v28 = vmul.f32 0.03125, %v1537_v34 }
 0x968   :  { %v1541_v24 = vsub.f32 %v1529_v26, %v1539_v28  ;;  %v1542_v32 = vmul.f32 %v1540_v35, %v1540_v35 }
 0x96a   :  { %v1544_v3 = vsel %vm75_vm1, %v1542_v32, 0.0  ;;  %v1543_v4 = vmul.f32 %v1541_v24, %v1541_v24 }
 0x96b   :  { %1545 = vadd.xlane.f32.xlu0 %v1544_v3 }
 0x96c   :  { %v1547_v36 = vsel %vm75_vm1, %v1543_v4, 0.0 }
 0x96d   :  { %1548 = vadd.xlane.f32.xlu1 %v1547_v36 }
 0x9f8   :  { %v1546_v37 = vpop.xlane.xlu0 %1545 }
 0x9f9   :  { %v1550_v38 = vmul.f32 0.03125, %v1546_v37 }
 0x9fa   :  { %v1549_v39 = vpop.xlane.xlu1 %1548 }
 0x9fb   :  { %v1552_v40 = vadd.f32 1e-12, %v1550_v38  ;;  %v1551_v41 = vmul.f32 0.03125, %v1549_v39 }
 0x9fd   :  { %1933 = vrsqrt.f32 %v1552_v40  ;;  %v1553_v42 = vadd.f32 1e-12, %v1551_v41 }
 0x9ff   :  { %1935 = vrsqrt.f32 %v1553_v42 }
 0xa07   :  { %v1934_v43 = vpop.eup %1933 }
 0xa08   :  { %v1556_v45 = vmul.f32 %v1934_v43, %v1540_v35 }
 0xa09   :  { %v1936_v46 = vpop.eup %1935 }
 0xa0a   :  { %v1557_v48 = vmul.f32 %v1936_v46, %v1541_v24  ;;  %v1564_v49 = vmul.f32 %v1643_v44, %v1556_v45 }
 0xa0c   :  { %v1565_v50 = vmul.f32 %v1643_v44, %v1557_v48  ;;  %v1572_v51 = vadd.f32 %v1644_v47, %v1564_v49 }
 0xa0e   :  { %v1573_v52 = vadd.f32 %v1644_v47, %v1565_v50  ;;  %1574 = vst.msk [vmem:[#allocation2] sm:$0xff] %vm75_vm1, %v1572_v51 }
 0xa10   :  { %1575 = vst.msk [vmem:[#allocation2 + $0x8] sm:$0xff] %vm75_vm1, %v1573_v52 }
 0xa11   :  { %1948 = shalt.err (!%p1945_p4)
}
 0xa12   :  { %s1949_s20 = scalar_lea.hbm %s2418_s14, 256 }
 0xa13   :  { %p1950_p5 = scmp.ne.s32.totalorder %s2418_s14, %s1949_s20  ;;  %p1953_p6 = scmp.lt.u32.totalorder %s1949_s20, %s2418_s14 }
 0xa15   :  { %p1955_p7 = pnand %p1953_p6, %p1950_p5 }
 0xa17   :  { %1958 = shalt.err (!%p1955_p7)
}
 0xa18   :  { %s1969_s22 = smov 128   ;;  %s1970_s0 = smov 8  }
 0xa19   :  { %1587 = dma.vmem_to_hbm [thread:$0]  %s1582_s18, 256, %s2418_s14, [#allocation3], %s1969_s22, %s1969_s22, %s1970_s0  }
 0xa1a   :  { %1959 = dma.done.wait [#allocation3], 256  }
 0xa1b   :  { %1960 = vsyncadd [#allocation3], 4294967040 }
 0xa1c   :  { %1591 = vsyncpa [#allocation3], 1 }

</bundles_post_ra>
